<compile_context>
chip_gen: v6e
topology: v6e:2x2x1
jax: 0.10.0
libtpu: 0.0.40
codegen_flags: <defaults>
</compile_context>

<pallas_src>
import functools
import math

import jax
import jax.numpy as jnp
from jax.experimental import pallas as pl
from jax.experimental.pallas import tpu as pltpu


def _round_up(x, m):
    return ((x + m - 1) // m) * m


def _vmem_budget_bytes():
    """Chip-aware VMEM budget: ~96 MiB on v5e/v6e (128 MiB physical),
    ~48 MiB on v7x (64 MiB physical)."""
    cap = 128 * 1024 * 1024
    try:
        info = pltpu.get_tpu_info()
        cap = int(getattr(info, "vmem_capacity_bytes", cap))
    except Exception:
        pass
    return int(min(100 * 1024 * 1024, cap * 3 // 4))


def _m_tiling(batch, compute_dtype, tm_pref):
    """Pick (Mp, tm): sublane-aligned for the compute dtype, >=2 batch blocks
    when the batch is large enough (keeps both v7x TensorCores busy)."""
    align = max(8, 32 // jnp.dtype(compute_dtype).itemsize)  # 8 f32 / 16 bf16
    mp0 = _round_up(batch, align)
    tm = min(tm_pref, mp0)
    if mp0 >= 2 * align and mp0 // tm < 2:
        tm = _round_up(-(-mp0 // 2), align)
    mp = _round_up(mp0, tm)
    return mp, tm


# ---------------------------------------------------------------------------
# Kernel 1: tiled Linear (+ optional fused LeakyReLU) with K-reduction grid
# ---------------------------------------------------------------------------
def _linear_kernel(x_ref, w_ref, b_ref, o_ref, acc_ref, *, apply_act,
                   negative_slope):
    k = pl.program_id(2)

    @pl.when(k == 0)
    def _():
        acc_ref[...] = jnp.zeros_like(acc_ref)

    acc_ref[...] += jnp.dot(x_ref[...], w_ref[...],
                            preferred_element_type=jnp.float32)

    # Epilogue only on the last K step: bias + activation + cast, once.
    @pl.when(k == pl.num_programs(2) - 1)
    def _():
        y = acc_ref[...] + b_ref[...]
        if apply_act:
            y = jnp.where(y > 0, y, negative_slope * y)
        o_ref[...] = y.astype(o_ref.dtype)


def _linear_padded(xp, wp, bp, *, apply_act, negative_slope, out_dtype,
                   tm, tn=512, tk=1024, vmem_budget=None):
    """Already-padded linear: xp (Mp, Kp), wp (Kp, Np), bp (1, Np) f32.
    Mp % tm == 0; Kp, Np multiples of 128.  Returns padded (Mp, Np)."""
    Mp, Kp = xp.shape
    Kw, Np = wp.shape
    assert Kw == Kp and Mp % tm == 0
    if vmem_budget is None:
        vmem_budget = _vmem_budget_bytes()

    tn = min(tn, Np)
    if Np % tn:
        tn = math.gcd(tn, Np)          # both multiples of 128
    tk = min(tk, Kp)
    if Kp % tk:
        tk = math.gcd(tk, Kp)

    grid = (Mp // tm, Np // tn, Kp // tk)
    kernel = functools.partial(_linear_kernel, apply_act=apply_act,
                               negative_slope=negative_slope)
    itemsize = jnp.dtype(xp.dtype).itemsize
    out = pl.pallas_call(
        kernel,
        out_shape=jax.ShapeDtypeStruct((Mp, Np), out_dtype),
        grid=grid,
        in_specs=[
            pl.BlockSpec((tm, tk), lambda i, j, k: (i, k)),
            pl.BlockSpec((tk, tn), lambda i, j, k: (k, j)),
            pl.BlockSpec((1, tn), lambda i, j, k: (0, j)),
        ],
        out_specs=pl.BlockSpec((tm, tn), lambda i, j, k: (i, j)),
        scratch_shapes=[pltpu.VMEM((tm, tn), jnp.float32)],
        compiler_params=pltpu.CompilerParams(
            dimension_semantics=("parallel", "parallel", "arbitrary"),
            vmem_limit_bytes=vmem_budget,
        ),
        cost_estimate=pl.CostEstimate(
            flops=2 * Mp * Kp * Np,
            transcendentals=0,
            # account for re-streaming of x across N tiles and w across M tiles
            bytes_accessed=(grid[1] * Mp * Kp * itemsize
                            + grid[0] * Kp * Np * itemsize
                            + Np * 4
                            + Mp * Np * jnp.dtype(out_dtype).itemsize),
        ),
    )(xp, wp, bp)
    return out


def linear_pallas(x, w, b, *, apply_act=False, negative_slope=0.2,
                  tm=256, tn=512, tk=1024, compute_dtype=None):
    """Standalone convenience: x (B, IN), w (IN, OUT), b (OUT,) -> (B, OUT)."""
    B, IN = x.shape
    OUT = w.shape[1]
    cdt = jnp.dtype(compute_dtype if compute_dtype is not None else x.dtype)
    Mp, tm = _m_tiling(B, cdt, tm)
    Kp = _round_up(IN, 128)
    Np = _round_up(OUT, 128)
    xp = jnp.pad(x.astype(cdt), ((0, Mp - B), (0, Kp - IN)))
    wp = jnp.pad(w.astype(cdt), ((0, Kp - IN), (0, Np - OUT)))
    bp = jnp.pad(b.astype(jnp.float32), (0, Np - OUT)).reshape(1, Np)
    out = _linear_padded(xp, wp, bp, apply_act=apply_act,
                         negative_slope=negative_slope, out_dtype=x.dtype,
                         tm=tm, tn=tn, tk=tk)
    return out[:B, :OUT]


# ---------------------------------------------------------------------------
# Kernel 2: whole Projection stack fused in one pallas_call
#   grid = (batch_tiles, n_layers); activation carried in VMEM scratch
#   (compute dtype), layer (l+1)'s weight DMA overlaps layer l's matmul.
# ---------------------------------------------------------------------------
def _projection_fused_kernel(x_ref, w_ref, b_ref, o_ref, act_ref, *,
                             n_layers, apply_act_between, negative_slope):
    l = pl.program_id(1)

    @pl.when(l == 0)
    def _():
        act_ref[...] = x_ref[...].astype(act_ref.dtype)

    # compute-dtype operands (bf16 native MXU path), f32 accumulation.
    y = jnp.dot(act_ref[...], w_ref[0], preferred_element_type=jnp.float32)
    y = y + b_ref[0]

    @pl.when(l < n_layers - 1)
    def _():
        z = y
        if apply_act_between:
            z = jnp.where(z > 0, z, negative_slope * z)
        act_ref[...] = z.astype(act_ref.dtype)

    @pl.when(l == n_layers - 1)
    def _():
        o_ref[...] = y.astype(o_ref.dtype)


def _projection_fused_call(xp, w_all, b_all, *, n_layers, apply_act_between,
                           negative_slope, tm, out_dtype, vmem_budget):
    Mp, D = xp.shape
    cdt = xp.dtype
    kernel = functools.partial(_projection_fused_kernel, n_layers=n_layers,
                               apply_act_between=apply_act_between,
                               negative_slope=negative_slope)
    itemsize = jnp.dtype(cdt).itemsize
    return pl.pallas_call(
        kernel,
        out_shape=jax.ShapeDtypeStruct((Mp, D), out_dtype),
        grid=(Mp // tm, n_layers),
        in_specs=[
            pl.BlockSpec((tm, D), lambda i, l: (i, 0)),       # x: resident over l
            pl.BlockSpec((1, D, D), lambda i, l: (l, 0, 0)),  # per-layer weight
            pl.BlockSpec((1, 1, D), lambda i, l: (l, 0, 0)),  # per-layer bias
        ],
        out_specs=pl.BlockSpec((tm, D), lambda i, l: (i, 0)),
        scratch_shapes=[pltpu.VMEM((tm, D), cdt)],            # running activation
        compiler_params=pltpu.CompilerParams(
            dimension_semantics=("parallel", "arbitrary"),
            vmem_limit_bytes=vmem_budget,
        ),
        cost_estimate=pl.CostEstimate(
            flops=2 * Mp * D * D * n_layers,
            transcendentals=0,
            bytes_accessed=(Mp * D * itemsize
                            + n_layers * D * D * itemsize
                            + n_layers * D * 4
                            + Mp * D * jnp.dtype(out_dtype).itemsize),
        ),
    )(xp, w_all, b_all)


# ---------------------------------------------------------------------------
# One-time parameter prep (hoists padding / packing out of the forward pass)
# ---------------------------------------------------------------------------
def prepare_projection(params, layer_type=0, *, compute_dtype=jnp.bfloat16,
                       negative_slope=0.2, use_fused=None, tm=256):
    n_layers = len(params)
    assert n_layers >= 1
    in_planes = params[0][0].shape[0]
    out_planes = params[-1][0].shape[1]
    dims = [in_planes] + [w.shape[1] for w, _ in params]
    cdt = jnp.dtype(compute_dtype)
    D = max(_round_up(d, 128) for d in dims)
    budget = _vmem_budget_bytes()

    if use_fused is None:
        # fused working set: double-buffered (D,D) weights + act scratch
        # + double-buffered x / out tiles (+ bias, negligible).
        fused_bytes = (2 * D * D * cdt.itemsize
                       + tm * D * cdt.itemsize
                       + 2 * tm * D * cdt.itemsize
                       + 2 * tm * D * 4
                       + 2 * D * 4)
        use_fused = fused_bytes <= int(budget * 0.8)

    prep = dict(
        fused=bool(use_fused),
        n_layers=n_layers,
        in_planes=in_planes,
        out_planes=out_planes,
        apply_act=(layer_type > 1),
        negative_slope=negative_slope,
        compute_dtype=cdt,
        tm=tm,
        vmem_budget=budget,
    )
    if use_fused:
        w_all = jnp.zeros((n_layers, D, D), cdt)
        b_all = jnp.zeros((n_layers, 1, D), jnp.float32)
        for l, (w, b) in enumerate(params):
            w_all = w_all.at[l, : w.shape[0], : w.shape[1]].set(w.astype(cdt))
            b_all = b_all.at[l, 0, : b.shape[0]].set(b.astype(jnp.float32))
        prep.update(D=D, w_all=w_all, b_all=b_all)
    else:
        layers = []
        for w, b in params:
            Kp = _round_up(w.shape[0], 128)
            Np = _round_up(w.shape[1], 128)
            wp = jnp.pad(w.astype(cdt),
                         ((0, Kp - w.shape[0]), (0, Np - w.shape[1])))
            bp = jnp.pad(b.astype(jnp.float32),
                         (0, Np - b.shape[0])).reshape(1, Np)
            layers.append((wp, bp))
        prep["layers"] = layers
    return prep


# ---------------------------------------------------------------------------
# Forward pass (matches Projection.forward)
# ---------------------------------------------------------------------------
def projection_forward(x, prep):
    B, IN = x.shape
    assert IN == prep["in_planes"]
    cdt = prep["compute_dtype"]
    out_dtype = x.dtype
    n_layers = prep["n_layers"]
    budget = prep["vmem_budget"]
    Mp, tm = _m_tiling(B, cdt, prep["tm"])

    if prep["fused"]:
        D = prep["D"]
        xp = jnp.pad(x.astype(cdt), ((0, Mp - B), (0, D - IN)))
        out = _projection_fused_call(
            xp, prep["w_all"], prep["b_all"], n_layers=n_layers,
            apply_act_between=prep["apply_act"] and n_layers > 1,
            negative_slope=prep["negative_slope"], tm=tm,
            out_dtype=out_dtype, vmem_budget=budget)
        return out[:B, : prep["out_planes"]]

    # Tiled path: keep activations padded (and in compute dtype) between
    # layers; slice / cast back only once at the very end.
    Kp0 = _round_up(IN, 128)
    act = jnp.pad(x.astype(cdt), ((0, Mp - B), (0, Kp0 - IN)))
    for i, (wp, bp) in enumerate(prep["layers"]):
        last = i == n_layers - 1
        act = _linear_padded(
            act, wp, bp,
            apply_act=prep["apply_act"] and not last,
            negative_slope=prep["negative_slope"],
            out_dtype=out_dtype if last else cdt,
            tm=tm, vmem_budget=budget)
    return act[:B, : prep["out_planes"]]


# ---------------------------------------------------------------------------
# Parameter init (mirrors Projection.__init__ + init_weight: xavier_normal_)
# ---------------------------------------------------------------------------
def init_projection_params(key, in_planes, out_planes=None, n_layers=1):
    if out_planes is None:
        out_planes = in_planes
    params = []
    _out = None
    for i in range(n_layers):
        _in = in_planes if i == 0 else _out
        _out = out_planes
        key, wk, bk = jax.random.split(key, 3)
        std = math.sqrt(2.0 / (_in + _out))              # xavier_normal_
        w = std * jax.random.normal(wk, (_in, _out), dtype=jnp.float32)
        bound = 1.0 / math.sqrt(_in)                     # default Linear bias
        b = jax.random.uniform(bk, (_out,), minval=-bound, maxval=bound,
                               dtype=jnp.float32)
        params.append((w, b))
    return params


# ---------------------------------------------------------------------------
# Reference (pure JAX) for sanity checks
# ---------------------------------------------------------------------------
def projection_ref(x, params, layer_type=0):
    n_layers = len(params)
    for i, (w, b) in enumerate(params):
        x = x @ w + b
        if (i < n_layers - 1) and (layer_type > 1):
            x = jnp.where(x > 0, x, 0.2 * x)
    return x


if __name__ == "__main__":
    key = jax.random.PRNGKey(0)
    kx, kp, kx2, kw2, kb2 = jax.random.split(key, 5)

    # --- Case 1: Projection(32 -> 32, n_layers=2, layer_type=2), batch=8 ---
    batch, in_planes, out_planes, n_layers, layer_type = 8, 32, 32, 2, 2
    x = jax.random.normal(kx, (batch, in_planes), dtype=jnp.float32)
    params = init_projection_params(kp, in_planes, out_planes, n_layers)
    ref = projection_ref(x, params, layer_type=layer_type)

    # Exact f32 compute: fused path
    prep_fused_f32 = prepare_projection(params, layer_type,
                                        compute_dtype=jnp.float32,
                                        use_fused=True)
    out_fused = jax.block_until_ready(projection_forward(x, prep_fused_f32))
    assert out_fused.shape == (batch, out_planes)
    assert jnp.allclose(out_fused, ref, atol=1e-5, rtol=1e-5)

    # Exact f32 compute: tiled path (per-layer kernel, padded activations)
    prep_tiled_f32 = prepare_projection(params, layer_type,
                                        compute_dtype=jnp.float32,
                                        use_fused=False)
    out_tiled = jax.block_until_ready(projection_forward(x, prep_tiled_f32))
    assert jnp.allclose(out_tiled, ref, atol=1e-5, rtol=1e-5)

    # Default fast path: bf16 operands, f32 accumulation (loose tolerance)
    prep_bf16 = prepare_projection(params, layer_type,
                                   compute_dtype=jnp.bfloat16)
    out_bf16 = jax.block_until_ready(projection_forward(x, prep_bf16))
    assert out_bf16.shape == (batch, out_planes)
    assert jnp.allclose(out_bf16, ref, atol=5e-2, rtol=5e-2)

    # --- Case 2: exercise multi-block M/N/K accumulation in the tiled path ---
    x2 = jax.random.normal(kx2, (16, 384), dtype=jnp.float32)
    w2 = 0.05 * jax.random.normal(kw2, (384, 256), dtype=jnp.float32)
    b2 = 0.05 * jax.random.normal(kb2, (256,), dtype=jnp.float32)
    out2 = jax.block_until_ready(
        linear_pallas(x2, w2, b2, apply_act=True, negative_slope=0.2,
                      tm=8, tn=128, tk=128))
    ref2 = x2 @ w2 + b2
    ref2 = jnp.where(ref2 > 0, ref2, 0.2 * ref2)
    assert out2.shape == (16, 256)
    assert jnp.allclose(out2, ref2, atol=1e-4, rtol=1e-4)

    print("KERNEL_OK")
</pallas_src>

<mosaic_0001>
module attributes {stable_mosaic.version = 11 : i64} {
  func.func @_projection_fused_kernel(%arg0: i32, %arg1: i32, %arg2: memref<8x128xf32, #tpu.memory_space<vmem>>, %arg3: memref<1x128x128xf32, #tpu.memory_space<vmem>>, %arg4: memref<1x1x128xf32, #tpu.memory_space<vmem>>, %arg5: memref<8x128xf32, #tpu.memory_space<vmem>>, %arg6: memref<8x128xf32, #tpu.memory_space<vmem>>) attributes {dimension_semantics = [#tpu.dimension_semantics<parallel>, #tpu.dimension_semantics<arbitrary>], iteration_bounds = array<i64: 1, 2>, scalar_prefetch = 0 : i64, scratch_operands = 1 : i64, tpu.core_type = #tpu.core_type<tc>, window_params = [{transform_indices = @transform_0, window_bounds = array<i64: 8, 128>}, {transform_indices = @transform_1, window_bounds = array<i64: 1, 128, 128>}, {transform_indices = @transform_2, window_bounds = array<i64: 1, 1, 128>}, {transform_indices = @transform_3, window_bounds = array<i64: 8, 128>}]} {
    %c0_i32 = arith.constant 0 : i32
    %0 = arith.cmpi eq, %arg1, %c0_i32 : i32
    %1 = arith.extui %0 : i1 to i32
    %c0_i32_0 = arith.constant 0 : i32
    %2 = arith.cmpi ne, %1, %c0_i32_0 : i32
    scf.if %2 {
      %c0_11 = arith.constant 0 : index
      %c0_12 = arith.constant 0 : index
      %17 = vector.load %arg2[%c0_11, %c0_12] : memref<8x128xf32, #tpu.memory_space<vmem>>, vector<8x128xf32>
      %c0_13 = arith.constant 0 : index
      %c0_14 = arith.constant 0 : index
      %18 = vector.load %arg6[%c0_13, %c0_14] : memref<8x128xf32, #tpu.memory_space<vmem>>, vector<8x128xf32>
      tpu.vector_store %arg6[%c0_13, %c0_14], %17 {strides = array<i32>} : memref<8x128xf32, #tpu.memory_space<vmem>>, vector<8x128xf32>,
    } else {
    }
    %c0 = arith.constant 0 : index
    %c0_1 = arith.constant 0 : index
    %3 = vector.load %arg6[%c0, %c0_1] : memref<8x128xf32, #tpu.memory_space<vmem>>, vector<8x128xf32>
    %c0_2 = arith.constant 0 : index
    %c0_3 = arith.constant 0 : index
    %c0_4 = arith.constant 0 : index
    %4 = vector.load %arg3[%c0_2, %c0_3, %c0_4] : memref<1x128x128xf32, #tpu.memory_space<vmem>>, vector<1x128x128xf32>
    %5 = vector.shape_cast %4 : vector<1x128x128xf32> to vector<128x128xf32>
    %cst = arith.constant dense<0.000000e+00> : vector<8x128xf32>
    %6 = tpu.matmul %3, %5, %cst {dimension_numbers = #tpu.dot_dimension_numbers<[1], [0], [0], [1], [0, 0, 1, 1], [], []>} : vector<8x128xf32>, vector<128x128xf32>, vector<8x128xf32> -> vector<8x128xf32>
    %c0_5 = arith.constant 0 : index
    %c0_6 = arith.constant 0 : index
    %c0_7 = arith.constant 0 : index
    %7 = vector.load %arg4[%c0_5, %c0_6, %c0_7] : memref<1x1x128xf32, #tpu.memory_space<vmem>>, vector<1x1x128xf32>
    %8 = vector.shape_cast %7 : vector<1x1x128xf32> to vector<1x128xf32>
    %9 = vector.broadcast %8 : vector<1x128xf32> to vector<8x128xf32>
    %10 = arith.addf %6, %9 : vector<8x128xf32>
    %c1_i32 = arith.constant 1 : i32
    %11 = arith.cmpi slt, %arg1, %c1_i32 : i32
    %12 = arith.extui %11 : i1 to i32
    %c0_i32_8 = arith.constant 0 : i32
    %13 = arith.cmpi ne, %12, %c0_i32_8 : i32
    scf.if %13 {
      %cst_11 = arith.constant 0.000000e+00 : f32
      %17 = vector.broadcast %cst_11 : f32 to vector<8x128xf32>
      %18 = arith.cmpf ogt, %10, %17 : vector<8x128xf32>
      %cst_12 = arith.constant 2.000000e-01 : f32
      %19 = vector.broadcast %cst_12 : f32 to vector<8x128xf32>
      %20 = arith.mulf %19, %10 : vector<8x128xf32>
      %21 = arith.select %18, %10, %20 : vector<8x128xi1>, vector<8x128xf32>
      %c0_13 = arith.constant 0 : index
      %c0_14 = arith.constant 0 : index
      %22 = vector.load %arg6[%c0_13, %c0_14] : memref<8x128xf32, #tpu.memory_space<vmem>>, vector<8x128xf32>
      tpu.vector_store %arg6[%c0_13, %c0_14], %21 {strides = array<i32>} : memref<8x128xf32, #tpu.memory_space<vmem>>, vector<8x128xf32>,
    } else {
    }
    %c1_i32_9 = arith.constant 1 : i32
    %14 = arith.cmpi eq, %arg1, %c1_i32_9 : i32
    %15 = arith.extui %14 : i1 to i32
    %c0_i32_10 = arith.constant 0 : i32
    %16 = arith.cmpi ne, %15, %c0_i32_10 : i32
    scf.if %16 {
      %c0_11 = arith.constant 0 : index
      %c0_12 = arith.constant 0 : index
      %17 = vector.load %arg5[%c0_11, %c0_12] : memref<8x128xf32, #tpu.memory_space<vmem>>, vector<8x128xf32>
      tpu.vector_store %arg5[%c0_11, %c0_12], %10 {strides = array<i32>} : memref<8x128xf32, #tpu.memory_space<vmem>>, vector<8x128xf32>,
    } else {
    }
    return
  }
  func.func @transform_0(%arg0: i32, %arg1: i32) -> (i32, i32) {
    %c0_i32 = arith.constant 0 : i32
    %c0_i32_0 = arith.constant 0 : i32
    return %arg0, %c0_i32 : i32, i32
  }
  func.func @transform_1(%arg0: i32, %arg1: i32) -> (i32, i32, i32) {
    %c0_i32 = arith.constant 0 : i32
    %c0_i32_0 = arith.constant 0 : i32
    %c0_i32_1 = arith.constant 0 : i32
    return %arg1, %c0_i32, %c0_i32_0 : i32, i32, i32
  }
  func.func @transform_2(%arg0: i32, %arg1: i32) -> (i32, i32, i32) {
    %c0_i32 = arith.constant 0 : i32
    %c0_i32_0 = arith.constant 0 : i32
    %c0_i32_1 = arith.constant 0 : i32
    return %arg1, %c0_i32, %c0_i32_0 : i32, i32, i32
  }
  func.func @transform_3(%arg0: i32, %arg1: i32) -> (i32, i32) {
    %c0_i32 = arith.constant 0 : i32
    %c0_i32_0 = arith.constant 0 : i32
    return %arg0, %c0_i32 : i32, i32
  }
}

</mosaic_0001>

<bundles_post_ra>
// kernel: tpu_custom_call.1
= control target key start
LH: loop header
LB: loop body
LE: loop exit
PB: predicated region body
PF: predicated region fallthrough
CT: control target
= control target key end

     0   :  { %8 = vsyncpa [#allocation4], 0  ;;  %s916_s0 = inlined_call_operand.hbm [shape: f32[8,128], index: 0, kind: input, shape index: {}]   ;;  %s917_s1 = inlined_call_operand.hbm [shape: f32[2,128,128], index: 1, kind: input, shape index: {}]   ;;  %s918_s2 = inlined_call_operand.vmem [shape: f32[2,1,128], index: 2, kind: input, shape index: {}]   ;;  %s919_s3 = inlined_call_operand.hbm [shape: f32[8,128], index: 3, kind: output, shape index: {}]  }
   0x1   :  { %9 = vsyncpa [#allocation7], 0 }
   0x2   :  { %11 = vsyncpa [#allocation7 + $0x1], 0 }
   0x3   :  { %12 = vsyncpa [#allocation5], 0  ;;  %s747_s12 = smov 0   ;;  %s749_s13 = smov 0  }
   0x4   :  { %s751_s14 = smov 0   ;;  %s753_s15 = smov 0  }
   0x5   :  { %s755_s16 = smov 0   ;;  %s757_s17 = smov 0  }
   0x6 LB: > { %s434_s18 = sadd.s32 4294967295, %s718_s17   ;;  %s63_s19 = sadd.s32 1, %s706_s14  ;;  %s718_s17 = sphi %s757_s17, %s18_s17   ;;  %s714_s16 = sphi %s755_s16, %s934_s16   ;;  %s710_s15 = sphi %s753_s15, %s933_s15   ;;  %s706_s14 = sphi %s751_s14, %s932_s14   ;;  %s702_s13 = sphi %s749_s13, %s931_s13   ;;  %s698_s12 = sphi %s747_s12, %s930_s12  }
   0x7   : > { %p70_p0 = scmp.ne.s32.totalorder %s706_s14, %s702_s13  ;;  %p71_p1 = scmp.eq.s32.totalorder %s718_s17, 0 }
   0x8   : > { %p76_p2 = scmp.ne.s32.totalorder %s702_s13, %s698_s12  ;;  %p783_p3 = scmp.eq.s32.totalorder %s434_s18, 0 }
   0x9   : > { %p72_p4 = por %p71_p1, %p70_p0  ;;  %p435_p5 = scmp.ge.s32.totalorder %s718_s17, 1 }
   0xa   : > { %p790_p6 = por %p783_p3, %p76_p2  ;;  %p139_p7 = scmp.lt.s32.totalorder %s718_s17, 3 }
   0xb   : > { %s720_s23 = smov [#allocation3]   ;;  %p524_p10 = scmp.lt.s32.totalorder %s718_s17, 2 }
   0xc   : > { %s923_s21 = scalar_select %p790_p6, 1, 0 }
   0xd   : > { %p795_p8 = pnand %p435_p5, %p139_p7  ;;  %s154_s24 = sshll.u32 %s720_s23, 4  ;;  %s155_s24 = int_to_ptr.vmem [resolvable:$true] %s154_s24 }
   0xe   : > { %s165_s25 = sand.u32 1, %s706_s14   ;;  %p805_p12 = pnand %p524_p10, %p72_p4 }
   0xf   : > { %s924_s22 = scalar_select %p795_p8, 1, 0 }
  0x10   : > { %p515_p9 = pneg %p795_p8  ;;  %s593_s27 = scalar_lea.vmem %s155_s24, 128 }
  0x11   : > { %p594_p0 = scmp.ne.s32.totalorder %s155_s24, %s593_s27  ;;  %p601_p5 = scmp.lt.s32.totalorder %s155_s24, %s155_s24 }
  0x12   : > { %p516_p11 = pnand %p515_p9, %p783_p3  ;;  %p602_p7 = scmp.lt.s32.totalorder %s593_s27, %s593_s27 }
  0x14   : > { %p584_p13 = pneg %p516_p11  ;;  %p603_p6 = por %p602_p7, %p601_p5 }
  0x16   : > { %p596_p1 = pnand %p594_p0, %p584_p13 }
  0x18   : > { %p597_p2 = pneg %p596_p1 }
  0x1a   : > { %p604_p8 = pnand %p603_p6, %p597_p2 }
  0x1c   : > { %607 = shalt.err (!%p604_p8)
}
  0x1d   : > { %518 = dma.hbm_to_vmem [thread:$0]  (!%p516_p11), %s916_s0, 128, %s155_s24, [#allocation4]  }
  0x1e   : > { %s27_s30 = sadd.s32 1, %s714_s16  ;;  %s438_s4 = sshll.u32 %s165_s25, 7 }
  0x1f   : > { %p28_p4 = scmp.ge.s32.totalorder %s27_s30, 2  ;;  %s452_s5 = sshll.u32 %s714_s16, 11 }
  0x20   : > { %s169_s6 = scalar_lea.vmem [#allocation6], %s438_s4  ;;  %s175_s10 = scalar_lea.hbm %s917_s1, %s452_s5 }
  0x21   : > { %s176_s7 = sshll.u32 %s169_s6, 4  ;;  %s936_s30 = smov (%p28_p4, %s27_s30), 0  ;;  %s177_s7 = int_to_ptr.vmem [resolvable:$true] %s176_s7 }
  0x22   : > { %s60_s11 = ssub.s32 %s714_s16, %s936_s30  ;;  %s166_s23 = scalar_lea.sflag [#allocation7], %s165_s25 }
  0x23   : > { %p821_p6 = scmp.eq.s32.totalorder %s60_s11, 0  ;;  %p610_p8 = pneg %p805_p12 }
  0x24   : > { %s621_s24 = scalar_lea.vmem %s177_s7, 2048  ;;  %s721_s27 = smov [#allocation6]  }
  0x25   : > { %p622_p9 = scmp.ne.s32.totalorder %s177_s7, %s621_s24  ;;  %s626_s28 = sshll.u32 %s721_s27, 4  ;;  %s627_s28 = int_to_ptr.vmem [resolvable:$false] %s626_s28 }
  0x26   : > { %s628_s29 = scalar_lea.vmem %s627_s28, 4096  ;;  %p629_p13 = scmp.lt.s32.totalorder %s177_s7, %s627_s28 }
  0x27   : > { %p624_p10 = pnand %p622_p9, %p610_p8  ;;  %p630_p0 = scmp.lt.s32.totalorder %s628_s29, %s621_s24 }
  0x29   : > { %p625_p11 = pneg %p624_p10  ;;  %p631_p1 = por %p630_p0, %p629_p13 }
  0x2b   : > { %p632_p2 = pnand %p631_p1, %p625_p11 }
  0x2d   : > { %635 = shalt.err (!%p632_p2)
}
  0x2e   : > { %s722_s4 = smov 128   ;;  %s723_s25 = smov 8  }
  0x2f   : > { %522 = dma.hbm_to_vmem [thread:$0]  (!%p805_p12), %s175_s10, 2048, %s177_s7, %s166_s23, %s722_s4, %s722_s4, %s723_s25  }
  0x30   : > { %s834_s5 = scalar_select %p821_p6, %s706_s14, %s63_s19  }
  0x31   : > { %p927_p5 = scmp.ne.s32.totalorder %s924_s22, 0 }
  0x33   : > { %194 = sbr.rel (%p927_p5) target bundleno = 326 (0x146), region = 32 }
  0x38   : > { %685 = dma.done.wait (%p783_p3), [#allocation4], 128  }
  0x39   : > { %687 = vsyncadd (%p783_p3), [#allocation4], 4294967168  ;;  %s200_s6 = sand.u32 1, %s702_s13   ;;  %p928_p12 = scmp.ne.s32.totalorder %s923_s21, 0 }
  0x3a   : > { %s443_s8 = sshll.u32 %s200_s6, 7  ;;  %s201_s9 = scalar_lea.sflag [#allocation7], %s200_s6 }
  0x3b   : > { %s843_s26 = scalar_lea.vmem [#allocation6], %s443_s8 }
  0x3c   : > { %689 = dma.done.wait (%p928_p12), %s201_s9, 2048  }
  0x3d   : > { %691 = vsyncadd (%p928_p12), %s201_s9, 4294965248  ;;  %p225_p7 = scmp.lt.s32.totalorder %s710_s15, 1  ;;  %p444_p3 = scmp.ne.s32.totalorder %s710_s15, 0 }
  0x3f   : > { %s851_s19 = scalar_select %p225_p7, %s710_s15, 1 }
  0x40   : > { %231 = sbr.rel (%p444_p3) target bundleno = 71 (0x47), region = 44 }
  0x41   : > { %s227_s7 = scalar_lea.vmem %s918_s2, %s851_s19 }
  0x45   : > { %v232_v0 = vld [vmem:[#allocation3] sm:$0xff] }
  0x46   : > { %233 = vst [vmem:[#allocation2] sm:$0xff] %v232_v0 }
  0x47 PF: > { %v250_v1 = vld [vmem:[%s843_s26 + $0x78] sm:$0xff]  ;;  %v724_v2 = vmov 0.0   ;;  %v249_v3 = vld [vmem:[%s843_s26 + $0x70] sm:$0xff]  ;;  %vm725_vm0 = vmmov 0   ;;  %v248_v4 = vld [vmem:[%s843_s26 + $0x68] sm:$0xff]  ;;  %p446_p4 = scmp.ge.s32.totalorder %s710_s15, 1 }
  0x48   : > { %470 = vmatprep.subr.mxu0 %v724_v2  ;;  %502 = vmatprep.mubr.msk.f32.mxu0 %vm725_vm0, %v724_v2  ;;  %v247_v5 = vld [vmem:[%s843_s26 + $0x60] sm:$0xff]  ;;  %v246_v6 = vld [vmem:[%s843_s26 + $0x58] sm:$0xff]  ;;  %v245_v7 = vld [vmem:[%s843_s26 + $0x50] sm:$0xff] }
  0x49   : > { %471 = vmatpush3.msra.mxu0 %v250_v1  ;;  %v244_v8 = vld [vmem:[%s843_s26 + $0x48] sm:$0xff]  ;;  %v243_v9 = vld [vmem:[%s843_s26 + $0x40] sm:$0xff]  ;;  %v242_v10 = vld [vmem:[%s843_s26 + $0x38] sm:$0xff] }
  0x4a   : > { %472 = vmatprep.subr.mxu0 %v724_v2  ;;  %v241_v11 = vld [vmem:[%s843_s26 + $0x30] sm:$0xff]  ;;  %v240_v12 = vld [vmem:[%s843_s26 + $0x28] sm:$0xff]  ;;  %v239_v13 = vld [vmem:[%s843_s26 + $0x20] sm:$0xff] }
  0x4b   : > { %473 = vmatpush3.msra.mxu0 %v249_v3  ;;  %v238_v14 = vld [vmem:[%s843_s26 + $0x18] sm:$0xff]  ;;  %v237_v15 = vld [vmem:[%s843_s26 + $0x10] sm:$0xff]  ;;  %v236_v16 = vld [vmem:[%s843_s26 + $0x8] sm:$0xff] }
  0x4c   : > { %474 = vmatprep.subr.mxu0 %v724_v2  ;;  %v235_v17 = vld [vmem:[%s843_s26] sm:$0xff]  ;;  %v445_v19 = vld [vmem:[%s227_s7] ss:$0 sm:$0xff] }
  0x4d   : > { %475 = vmatpush3.msra.mxu0 %v248_v4  ;;  %v234_v18 = vld [vmem:[#allocation2] sm:$0xff] }
  0x4e   : > { %476 = vmatprep.subr.mxu0 %v724_v2 }
  0x4f   : > { %477 = vmatpush3.msra.mxu0 %v247_v5 }
  0x50   : > { %478 = vmatprep.subr.mxu0 %v724_v2 }
  0x51   : > { %479 = vmatpush3.msra.mxu0 %v246_v6 }
  0x52   : > { %480 = vmatprep.subr.mxu0 %v724_v2 }
  0x53   : > { %481 = vmatpush3.msra.mxu0 %v245_v7 }
  0x54   : > { %482 = vmatprep.subr.mxu0 %v724_v2 }
  0x55   : > { %483 = vmatpush3.msra.mxu0 %v244_v8 }
  0x56   : > { %484 = vmatprep.subr.mxu0 %v724_v2 }
  0x57   : > { %485 = vmatpush3.msra.mxu0 %v243_v9 }
  0x58   : > { %486 = vmatprep.subr.mxu0 %v724_v2 }
  0x59   : > { %487 = vmatpush3.msra.mxu0 %v242_v10 }
  0x5a   : > { %488 = vmatprep.subr.mxu0 %v724_v2 }
  0x5b   : > { %489 = vmatpush3.msra.mxu0 %v241_v11 }
  0x5c   : > { %490 = vmatprep.subr.mxu0 %v724_v2 }
  0x5d   : > { %491 = vmatpush3.msra.mxu0 %v240_v12 }
  0x5e   : > { %492 = vmatprep.subr.mxu0 %v724_v2 }
  0x5f   : > { %493 = vmatpush3.msra.mxu0 %v239_v13 }
  0x60   : > { %494 = vmatprep.subr.mxu0 %v724_v2 }
  0x61   : > { %495 = vmatpush3.msra.mxu0 %v238_v14 }
  0x62   : > { %496 = vmatprep.subr.mxu0 %v724_v2 }
  0x63   : > { %497 = vmatpush3.msra.mxu0 %v237_v15 }
  0x64   : > { %498 = vmatprep.subr.mxu0 %v724_v2 }
  0x65   : > { %499 = vmatpush3.msra.mxu0 %v236_v16 }
  0x66   : > { %500 = vmatprep.subr.mxu0 %v724_v2 }
  0x67   : > { %501 = vmatpush3.msra.mxu0 %v235_v17 }
  0x68   : > { %503 = vmatmul.mubr.f32.vlgmr.msra.gmra.mxu0 %v234_v18 }
 0x126   : > { %331 = sbr.rel (%p446_p4) target bundleno = 303 (0x12f), region = 48 }
 0x128   : > { %v324_v20 = vpop.f32.mrf.mxu0 }
 0x129   : > { %v325_v21 = vadd.f32 %v445_v19, %v324_v20 }
 0x12a   : > { %v504_v22 = vpop.f32.mrf.mxu0 }
 0x12b   : > { %vm332_vm1 = vcmp.gt.f32.partialorder %v325_v21, 0.0  ;;  %v333_v23 = vmul.f32 0.2, %v325_v21 }
 0x12d   : > { %v334_v24 = vsel %vm332_vm1, %v325_v21, %v333_v23 }
 0x12e   : > { %335 = vst [vmem:[#allocation2] sm:$0xff] %v334_v24 }
 0x12f PF: > { %p447_p6 = scmp.ne.s32.totalorder %s710_s15, 1 }
 0x131   : > { %339 = sbr.rel (%p447_p6) target bundleno = 311 (0x137), region = 52 }
 0x136   : > { %340 = vst [vmem:[#allocation8] sm:$0xff] %v325_v21 }
 0x137 PF: > { %p883_p8 = scmp.eq.s32.totalorder %s434_s18, 1  ;;  %s726_s12 = smov [#allocation8]  }
 0x138   : > { %s350_s23 = sshll.u32 %s726_s12, 4  ;;  %s351_s23 = int_to_ptr.vmem [resolvable:$true] %s350_s23 }
 0x139   : > { %s636_s24 = scalar_lea.vmem %s351_s23, 128  ;;  %p643_p13 = scmp.lt.s32.totalorder %s351_s23, %s351_s23 }
 0x13a   : > { %p637_p9 = scmp.ne.s32.totalorder %s351_s23, %s636_s24  ;;  %p644_p0 = scmp.lt.s32.totalorder %s636_s24, %s636_s24 }
 0x13c   : > { %p638_p10 = pnand %p637_p9, %p883_p8  ;;  %p645_p1 = por %p644_p0, %p643_p13 }
 0x13e   : > { %p639_p11 = pneg %p638_p10 }
 0x140   : > { %p646_p2 = pnand %p645_p1, %p639_p11 }
 0x142   : > { %649 = shalt.err (!%p646_p2)
}
 0x143   : > { %512 = dma.vmem_to_hbm [thread:$0]  (%p883_p8), %s351_s23, 128, %s919_s3, [#allocation5]  }
 0x144   : > { %693 = dma.done.wait (%p883_p8), [#allocation5], 128  }
 0x145   : > { %695 = vsyncadd (%p883_p8), [#allocation5], 4294967168 }
 0x146 PF: > { %s18_s17 = sadd.s32 1, %s718_s17   ;;  %s930_s12 = smov %s702_s13 }
 0x147   : > { %p15_p5 = scmp.ge.s32.totalorder %s18_s17, 4   ;;  %s931_s13 = smov %s706_s14 }
 0x148   : > { %s932_s14 = smov %s834_s5  ;;  %s933_s15 = smov %s714_s16 }
 0x149   : > { %s934_s16 = smov %s936_s30  ;;  %17 = sbr.rel (!%p15_p5) target bundleno = 6 (0x6), region = 91 }
 0x14e   :  { %363 = vsyncpa [#allocation4], 1 }
 0x14f   :  { %365 = vsyncpa [#allocation4 + $0x1], 1 }
 0x150   :  { %366 = vsyncpa [#allocation7], 1 }
 0x151   :  { %368 = vsyncpa [#allocation7 + $0x1], 1 }
 0x152   :  { %369 = vsyncpa [#allocation5], 1 }
 0x153   :  { %371 = vsyncpa [#allocation5 + $0x1], 1 }

</bundles_post_ra>
